<compile_context>
chip_gen: v7x
topology: tpu7x:2x2x1
jax: 0.10.0
libtpu: 0.0.40
codegen_flags: <defaults>
</compile_context>

<pallas_src>
import jax
import jax.numpy as jnp
from jax.experimental import pallas as pl
from jax.experimental.pallas import tpu as pltpu


def _hbm_copy_kernel(x_hbm_ref, o_hbm_ref, sem):
    # Single contiguous HBM -> HBM DMA; no VMEM staging, no vld/vst body.
    cp = pltpu.make_async_copy(x_hbm_ref, o_hbm_ref, sem)
    cp.start()
    cp.wait()


def _materializing_identity(video):
    """Pallas identity copy into a fresh HBM buffer (only when explicitly
    requested).  One whole-array HBM->HBM DMA — roofline on all generations."""
    nbytes = video.size * video.dtype.itemsize
    return pl.pallas_call(
        _hbm_copy_kernel,
        out_shape=jax.ShapeDtypeStruct(video.shape, video.dtype),
        in_specs=[pl.BlockSpec(memory_space=pl.ANY)],
        out_specs=pl.BlockSpec(memory_space=pl.ANY),
        scratch_shapes=[pltpu.SemaphoreType.DMA(())],
        cost_estimate=pl.CostEstimate(
            flops=0, transcendentals=0, bytes_accessed=2 * nbytes
        ),
    )(video)


def learnable_similarity_forward(video, materialize=False):
    """Forward pass of LearnableSimilarity.

    The reference forward is the identity, so the default (hot) path returns
    `video` unchanged — no kernel launch, no HBM traffic.  The unused
    self_similarity Linear parameters are intentionally NOT part of this
    signature (they are module state only; see `init_params`).

    Set `materialize=True` to force a fresh output buffer via a single
    HBM->HBM DMA inside a Pallas kernel.
    """
    if not materialize:
        return video
    return _materializing_identity(video)


def init_params(input_dim=128, output_dim=128, seed=0):
    """Deterministic init of the module's (unused-in-forward) nn.Linear.

    Matches PyTorch's default bound 1/sqrt(fan_in) in magnitude (not the exact
    kaiming_uniform RNG stream) — harmless since forward never applies it.
    """
    key = jax.random.PRNGKey(seed)
    kw, kb = jax.random.split(key)
    bound = 1.0 / (input_dim ** 0.5)
    weight = jax.random.uniform(kw, (output_dim, input_dim),
                                minval=-bound, maxval=bound, dtype=jnp.float32)
    bias = jax.random.uniform(kb, (output_dim,),
                              minval=-bound, maxval=bound, dtype=jnp.float32)
    return weight, bias


if __name__ == "__main__":
    input_dim = 128
    output_dim = 128
    B, T = 2, 8  # small batch / sequence of per-frame feature vectors

    # Module state for parity with __init__ (never applied in forward).
    weight, bias = init_params(input_dim, output_dim, seed=0)

    key = jax.random.PRNGKey(0)
    video = jax.random.normal(key, (B, T, input_dim), dtype=jnp.float32)

    # Default hot path: identity, zero-cost (no kernel, no HBM traffic).
    out_fast = jax.block_until_ready(learnable_similarity_forward(video))
    assert out_fast.shape == video.shape and out_fast.dtype == video.dtype
    assert bool(jnp.all(out_fast == video))

    # Explicitly materialized path: single HBM->HBM DMA Pallas kernel.
    out_copy = jax.block_until_ready(
        learnable_similarity_forward(video, materialize=True))
    assert out_copy.shape == video.shape and out_copy.dtype == video.dtype
    assert bool(jnp.all(out_copy == video))

    print("KERNEL_OK")
</pallas_src>

<mosaic_0001>
module attributes {stable_mosaic.version = 11 : i64} {
  func.func @_hbm_copy_kernel(%arg0: memref<2x8x128xf32, #tpu.memory_space<any>>, %arg1: memref<2x8x128xf32, #tpu.memory_space<any>>, %arg2: memref<!tpu.dma_semaphore, #tpu.memory_space<semaphore_mem>>) attributes {dimension_semantics = [], scalar_prefetch = 0 : i64, scratch_operands = 1 : i64, tpu.core_type = #tpu.core_type<tc>} {
    tpu.enqueue_dma source(%arg0 : memref<2x8x128xf32, #tpu.memory_space<any>>) target(%arg1 : memref<2x8x128xf32, #tpu.memory_space<any>>) target_semaphore(%arg2 : memref<!tpu.dma_semaphore, #tpu.memory_space<semaphore_mem>>)
    tpu.wait_dma2 semaphore(%arg2 : memref<!tpu.dma_semaphore, #tpu.memory_space<semaphore_mem>>) src(%arg0 : memref<2x8x128xf32, #tpu.memory_space<any>>) dst(%arg1 : memref<2x8x128xf32, #tpu.memory_space<any>>)
    return
  }
}

</mosaic_0001>

<bundles_post_ra>
// kernel: tpu_custom_call.1
= control target key start
LH: loop header
LB: loop body
LE: loop exit
PB: predicated region body
PF: predicated region fallthrough
CT: control target
= control target key end

     0   :  { %s35_s6 = smov [#allocation2]   ;;  %s36_s7 = smov [#allocation3]   ;;  %s54_s0 = inlined_call_operand.hbm [shape: f32[2,8,128], index: 0, kind: input, shape index: {}]   ;;  %s55_s1 = inlined_call_operand.hbm [shape: f32[2,8,128], index: 1, kind: output, shape index: {}]  }
   0x1   :  { %s37_s8 = smov 0  }
   0x2   :  { %18 = dma.general %s54_s0, 256, %s55_s1, %s35_s6, %s36_s7, [#allocation4], %s37_s8, 0  }
   0x3   :  { %33 = dma.done.wait [#allocation2], 256 }
   0x4   :  { %34 = vsyncadd [#allocation2], 4294967040 }
   0x5   :  { %23 = vsyncmov [#allocation2] }
   0x8   :  { %s24_s13 = vpop.sfrf %23 }
   0x9   :  { %p29_p0 = scmp.ne.s32.totalorder %s24_s13, 0 }
   0xb   :  { %28 = shalt.err (%p29_p0)  }

</bundles_post_ra>
